<compile_context>
chip_gen: v5e
topology: v5e:2x2
jax: 0.10.0
libtpu: 0.0.40
codegen_flags: <defaults>
</compile_context>

<pallas_src>
import functools

import jax
import jax.numpy as jnp
from jax import lax
from jax.experimental import pallas as pl
from jax.experimental.pallas import tpu as pltpu

TEMPERATURE = 0.1
_MIB = 1024 * 1024


def _round_up(x, m):
    return -(-x // m) * m


def _vmem_capacity_bytes():
    """Physical VMEM of the attached TPU; conservative 64 MiB (v7x) fallback."""
    try:
        return int(pltpu.get_tpu_info().vmem_capacity_bytes)
    except Exception:
        return 64 * _MIB


# ---------------------------------------------------------------------------
# Kernel 1: pipelined mean over the (folded) token axis, f32 accumulation.
# ---------------------------------------------------------------------------
def _mean_over_t_kernel(feat_ref, fm_ref, *, inv_t):
    t = pl.program_id(1)

    @pl.when(t == 0)
    def _():
        fm_ref[...] = jnp.zeros_like(fm_ref)

    chunk = feat_ref[...].astype(jnp.float32)            # (tB, tT, D_eff)
    fm_ref[...] += jnp.sum(chunk, axis=1)                # partial sum of this chunk

    @pl.when(t == pl.num_programs(1) - 1)
    def _():
        fm_ref[...] = fm_ref[...] * jnp.float32(inv_t)   # divide by the true T


# ---------------------------------------------------------------------------
# Kernel 2: row-tiled contrastive cross-entropy epilogue on the (B, D) means.
# ---------------------------------------------------------------------------
def _contrastive_epilogue_kernel(fm_rows_ref, fm_all_ref, lab_col_ref,
                                 lab_row_ref, scores_ref, out_ref, *,
                                 temperature, n_valid):
    r = pl.program_id(0)

    @pl.when(r == 0)
    def _():
        out_ref[...] = jnp.zeros_like(out_ref)

    inv_temp = jnp.float32(1.0 / temperature)
    fm_rows = fm_rows_ref[...]                           # (tR, D) f32

    # similarities = fm_rows @ fm_all.T / temperature   (MXU, f32 accumulate)
    sims = lax.dot_general(fm_rows, fm_all_ref[...], (((1,), (1,)), ((), ())),
                           preferred_element_type=jnp.float32) * inv_temp
    # diag(fm @ fm.T) == row-wise sum of squares (no iota / select / gather).
    diag = jnp.sum(fm_rows * fm_rows, axis=-1, keepdims=True) * inv_temp

    pos = (lab_col_ref[...] == lab_row_ref[...]).astype(jnp.float32)  # (tR, B)
    masked = sims + (jnp.float32(1.0) - pos) * jnp.float32(-1e30)

    row_max = jnp.max(masked, axis=-1, keepdims=True)
    lse = jnp.log(jnp.sum(jnp.exp(masked - row_max), axis=-1,
                          keepdims=True)) + row_max                    # (tR, 1)

    # Padded rows (zero features + unique sentinel labels) give lse == diag == 0,
    # so they contribute exactly nothing to the running sum.
    out_ref[...] += jnp.sum(lse - diag, axis=0, keepdims=True)

    @pl.when(r == pl.num_programs(0) - 1)
    def _():
        # weights = scores / (scores.sum() + 1e-10);
        # (contrastive * weights).sum() = (sum_loss / B) * (s_sum / (s_sum+eps))
        s_sum = jnp.sum(scores_ref[...], axis=-1, keepdims=True)
        w_sum = s_sum / (s_sum + jnp.float32(1e-10))
        out_ref[...] = out_ref[...] * w_sum * jnp.float32(1.0 / n_valid)


# ---------------------------------------------------------------------------
# Tiling heuristics
# ---------------------------------------------------------------------------
def _choose_lane_fold(T, D):
    """Fold g tokens into lanes, (T, D) -> (T//g, g*D), so lanes are dense."""
    if D >= 128:
        return 1
    for g in range(max(1, 128 // D), 0, -1):
        if T % g == 0:
            return g
    return 1


def _choose_tiles(B, T_fold, D_eff, itemsize, vmem_cap):
    sub = 16 if itemsize == 2 else 8      # bf16 packs 16 sublanes per vreg

    # B tile: multiple of 8, <=128, and nB >= 2 whenever B > 8 (v7x megacore).
    if B <= 8:
        tB, B_pad = B, B
    else:
        B8 = _round_up(B, 8)
        nB = max(2, -(-B8 // 128))
        tB = _round_up(-(-B8 // nB), 8)
        B_pad = _round_up(B, tB)

    # T tile: sized by BYTES against the lane-padded footprint (no row cap);
    # per-buffer target is ~1/4 of physical VMEM, clamped to [4, 32] MiB.
    lane_D = _round_up(D_eff, 128)
    target = max(4 * _MIB, min(32 * _MIB, vmem_cap // 4))
    tT = target // max(1, tB * lane_D * itemsize)
    tT = max(sub, (tT // sub) * sub)
    if tT >= T_fold:
        tT = T_fold                       # single block == full (folded) T dim
    T_pad = _round_up(T_fold, tT)
    return tB, B_pad, tT, T_pad


def _call1_vmem_limit(tB, tT, D_eff, itemsize, vmem_cap):
    sub = 16 if itemsize == 2 else 8
    lane_D = _round_up(D_eff, 128)
    in_buf = tB * _round_up(tT, sub) * lane_D * itemsize
    out_buf = _round_up(tB, 8) * lane_D * 4
    need = 2 * in_buf + 2 * out_buf + 4 * _MIB     # double-buffered + scratch margin
    return int(min(vmem_cap - 8 * _MIB, max(need, 16 * _MIB)))


# ---------------------------------------------------------------------------
# Wrapper
# ---------------------------------------------------------------------------
def classify_loss(features, labels, scores, *, temperature=TEMPERATURE,
                  t_block=None, row_block=None):
    """features: (B, T, D) f32/bf16 (kept in native dtype in HBM),
    labels: (B,) int, scores: (B,) float. Returns the scalar weighted loss."""
    B, T, D = features.shape
    itemsize = jnp.dtype(features.dtype).itemsize
    vmem_cap = _vmem_capacity_bytes()

    # ---- lane fold: (B, T, D) -> (B, T//g, g*D); free row-major reshape ------
    g = _choose_lane_fold(T, D)
    T_fold, D_eff = T // g, g * D
    feats = features.reshape(B, T_fold, D_eff) if g > 1 else features

    tB, B_pad, tT, T_pad = _choose_tiles(B, T_fold, D_eff, itemsize, vmem_cap)
    if t_block is not None:               # manual override (tests): clamp to valid
        sub = 16 if itemsize == 2 else 8
        tT = max(sub, (int(t_block) // sub) * sub)
        if tT >= T_fold:
            tT = T_fold
        T_pad = _round_up(T_fold, tT)

    if (B_pad != B) or (T_pad != T_fold):
        # zero padding does not change the T-sum; we divide by the true T.
        feats = jnp.pad(feats, ((0, B_pad - B), (0, T_pad - T_fold), (0, 0)))

    nB, nT = B_pad // tB, T_pad // tT

    # ---- Call 1: pipelined mean over T (B parallel for megacore) -------------
    stream_bytes = B_pad * T_pad * D_eff * itemsize + B_pad * D_eff * 4
    fm_wide = pl.pallas_call(
        functools.partial(_mean_over_t_kernel, inv_t=1.0 / T),
        out_shape=jax.ShapeDtypeStruct((B_pad, D_eff), jnp.float32),
        grid=(nB, nT),
        in_specs=[pl.BlockSpec((tB, tT, D_eff), lambda b, t: (b, t, 0))],
        out_specs=pl.BlockSpec((tB, D_eff), lambda b, t: (b, 0)),
        compiler_params=pltpu.CompilerParams(
            dimension_semantics=("parallel", "arbitrary"),
            vmem_limit_bytes=_call1_vmem_limit(tB, tT, D_eff, itemsize, vmem_cap)),
        cost_estimate=pl.CostEstimate(
            flops=B_pad * T_pad * D_eff, transcendentals=0,
            bytes_accessed=stream_bytes),
    )(feats)

    # Undo the lane fold on the tiny (B, g*D) result in plain JAX.
    fm = fm_wide[:B] if B_pad != B else fm_wide
    if g > 1:
        fm = fm.reshape(B, g, D).sum(axis=1)

    # ---- Call 2: row-tiled epilogue (gram + masked softmax CE + weighting) ---
    # TODO(synk): on single-TC v5e/v6e with tiny workloads this could be fused
    # into call 1 (saving a launch + the fm HBM round-trip); kept separate so
    # the B axis of call 1 stays megacore-parallel on v7x.
    if row_block is None:
        tR = B if B <= 128 else 128
    else:
        tR = min(int(row_block), B)
        if tR < B:
            tR = max(8, (tR // 8) * 8)
    B_pad_r = _round_up(B, tR)
    nR = B_pad_r // tR

    lab = labels.reshape(B).astype(jnp.int32)
    sc = scores.reshape(B).astype(jnp.float32)
    pad_n = B_pad_r - B
    if pad_n:
        fm = jnp.pad(fm, ((0, pad_n), (0, 0)))
        # Unique sentinel labels: each padded row is positive only with itself,
        # so its CE loss is exactly 0 (no in-kernel validity mask needed).
        sentinels = (-jnp.arange(1, pad_n + 1, dtype=jnp.int32)
                     - jnp.int32(1_000_000_000))
        lab = jnp.concatenate([lab, sentinels])
        sc = jnp.pad(sc, (0, pad_n))

    lab_col = lab.reshape(B_pad_r, 1)
    lab_row = lab.reshape(1, B_pad_r)
    sc_row = sc.reshape(1, B_pad_r)

    out = pl.pallas_call(
        functools.partial(_contrastive_epilogue_kernel,
                          temperature=temperature, n_valid=B),
        out_shape=jax.ShapeDtypeStruct((1, 1), jnp.float32),
        grid=(nR,),
        in_specs=[
            pl.BlockSpec((tR, D), lambda r: (r, 0)),          # fm rows (tiled)
            pl.BlockSpec((B_pad_r, D), lambda r: (0, 0)),     # fm all (resident)
            pl.BlockSpec((tR, 1), lambda r: (r, 0)),          # labels column
            pl.BlockSpec((1, B_pad_r), lambda r: (0, 0)),     # labels row
            pl.BlockSpec((1, B_pad_r), lambda r: (0, 0)),     # scores row
        ],
        out_specs=pl.BlockSpec((1, 1), lambda r: (0, 0)),
        compiler_params=pltpu.CompilerParams(
            dimension_semantics=("arbitrary",)),
    )(fm, fm, lab_col, lab_row, sc_row)
    return out[0, 0]


def _reference(features, labels, scores, temperature=TEMPERATURE):
    """Pure-JAX reference mirroring the PyTorch forward."""
    fm = features.astype(jnp.float32).mean(axis=1)
    sims = fm @ fm.T / temperature
    pos = labels[:, None] == labels[None, :]
    masked = jnp.where(pos, sims, -jnp.inf)
    lse = jax.scipy.special.logsumexp(masked, axis=-1)
    contrastive = jnp.mean(lse - jnp.diag(sims))
    w = scores / (scores.sum() + 1e-10)
    return (contrastive * w).sum()


if __name__ == "__main__":
    root = jax.random.PRNGKey(0)

    def run_case(case_id, B, T, D, dtype, rtol, atol, **kw):
        k1, k2, k3 = jax.random.split(jax.random.fold_in(root, case_id), 3)
        features = jax.random.normal(k1, (B, T, D), dtype=jnp.float32).astype(dtype)
        labels = jax.random.randint(k2, (B,), 0, 3, dtype=jnp.int32)
        scores = jax.random.uniform(k3, (B,), dtype=jnp.float32,
                                    minval=0.1, maxval=1.0)
        out = classify_loss(features, labels, scores, **kw)
        jax.block_until_ready(out)
        ref = _reference(features, labels, scores)
        assert jnp.allclose(out, ref, rtol=rtol, atol=atol), (case_id, out, ref)

    # 1) f32: lane fold g=4 (D=32 -> 128 lanes), 2x2 grid in call 1 (nB=2 for
    #    megacore + pipelined T axis), single-block epilogue.
    run_case(1, 16, 64, 32, jnp.float32, 1e-4, 1e-4, t_block=8)
    # 2) bf16 with odd shapes: bf16 sublane (16) rounding, B/T padding, and the
    #    row-tiled epilogue with sentinel-labelled padded rows.
    run_case(2, 12, 40, 48, jnp.bfloat16, 2e-3, 2e-3, t_block=8, row_block=8)
    # 3) default heuristics, no overrides.
    run_case(3, 16, 32, 32, jnp.float32, 1e-4, 1e-4)

    print("KERNEL_OK")
</pallas_src>

<mosaic_0001>
module attributes {stable_mosaic.version = 11 : i64} {
  func.func @_mean_over_t_kernel(%arg0: i32, %arg1: i32, %arg2: memref<8x8x128xf32, #tpu.memory_space<vmem>>, %arg3: memref<8x128xf32, #tpu.memory_space<vmem>>) attributes {dimension_semantics = [#tpu.dimension_semantics<parallel>, #tpu.dimension_semantics<arbitrary>], iteration_bounds = array<i64: 2, 2>, scalar_prefetch = 0 : i64, scratch_operands = 0 : i64, tpu.core_type = #tpu.core_type<tc>, window_params = [{transform_indices = @transform_0, window_bounds = array<i64: 8, 8, 128>}, {transform_indices = @transform_1, window_bounds = array<i64: 8, 128>}]} {
    %c0_i32 = arith.constant 0 : i32
    %0 = arith.cmpi eq, %arg1, %c0_i32 : i32
    %1 = arith.extui %0 : i1 to i32
    %c0_i32_0 = arith.constant 0 : i32
    %2 = arith.cmpi ne, %1, %c0_i32_0 : i32
    scf.if %2 {
      %cst_8 = arith.constant 0.000000e+00 : f32
      %11 = vector.broadcast %cst_8 : f32 to vector<8x128xf32>
      %c0_9 = arith.constant 0 : index
      %c0_10 = arith.constant 0 : index
      %12 = vector.load %arg3[%c0_9, %c0_10] : memref<8x128xf32, #tpu.memory_space<vmem>>, vector<8x128xf32>
      tpu.vector_store %arg3[%c0_9, %c0_10], %11 {strides = array<i32>} : memref<8x128xf32, #tpu.memory_space<vmem>>, vector<8x128xf32>,
    } else {
    }
    %c0 = arith.constant 0 : index
    %c0_1 = arith.constant 0 : index
    %c0_2 = arith.constant 0 : index
    %3 = vector.load %arg2[%c0, %c0_1, %c0_2] : memref<8x8x128xf32, #tpu.memory_space<vmem>>, vector<8x8x128xf32>
    %c0_3 = arith.constant 0 : index
    %c0_4 = arith.constant 0 : index
    %4 = vector.load %arg3[%c0_3, %c0_4] : memref<8x128xf32, #tpu.memory_space<vmem>>, vector<8x128xf32>
    %cst = arith.constant dense<0.000000e+00> : vector<8x128xf32>
    %5 = vector.multi_reduction <add>, %3, %cst [1] : vector<8x8x128xf32> to vector<8x128xf32>
    %6 = arith.addf %4, %5 : vector<8x128xf32>
    %c0_5 = arith.constant 0 : index
    %c0_6 = arith.constant 0 : index
    %7 = vector.load %arg3[%c0_5, %c0_6] : memref<8x128xf32, #tpu.memory_space<vmem>>, vector<8x128xf32>
    tpu.vector_store %arg3[%c0_5, %c0_6], %6 {strides = array<i32>} : memref<8x128xf32, #tpu.memory_space<vmem>>, vector<8x128xf32>,
    %c1_i32 = arith.constant 1 : i32
    %8 = arith.cmpi eq, %arg1, %c1_i32 : i32
    %9 = arith.extui %8 : i1 to i32
    %c0_i32_7 = arith.constant 0 : i32
    %10 = arith.cmpi ne, %9, %c0_i32_7 : i32
    scf.if %10 {
      %c0_8 = arith.constant 0 : index
      %c0_9 = arith.constant 0 : index
      %11 = vector.load %arg3[%c0_8, %c0_9] : memref<8x128xf32, #tpu.memory_space<vmem>>, vector<8x128xf32>
      %cst_10 = arith.constant 1.562500e-02 : f32
      %12 = vector.broadcast %cst_10 : f32 to vector<8x128xf32>
      %13 = arith.mulf %11, %12 : vector<8x128xf32>
      %c0_11 = arith.constant 0 : index
      %c0_12 = arith.constant 0 : index
      %14 = vector.load %arg3[%c0_11, %c0_12] : memref<8x128xf32, #tpu.memory_space<vmem>>, vector<8x128xf32>
      tpu.vector_store %arg3[%c0_11, %c0_12], %13 {strides = array<i32>} : memref<8x128xf32, #tpu.memory_space<vmem>>, vector<8x128xf32>,
    } else {
    }
    return
  }
  func.func @transform_0(%arg0: i32, %arg1: i32) -> (i32, i32, i32) {
    %c0_i32 = arith.constant 0 : i32
    %c0_i32_0 = arith.constant 0 : i32
    return %arg0, %arg1, %c0_i32 : i32, i32, i32
  }
  func.func @transform_1(%arg0: i32, %arg1: i32) -> (i32, i32) {
    %c0_i32 = arith.constant 0 : i32
    %c0_i32_0 = arith.constant 0 : i32
    return %arg0, %c0_i32 : i32, i32
  }
}

</mosaic_0001>

<bundles_post_ra>
// kernel: tpu_custom_call.1
= control target key start
LH: loop header
LB: loop body
LE: loop exit
PB: predicated region body
PF: predicated region fallthrough
CT: control target
= control target key end

     0   :  { %6 = vsyncpa [#allocation3], 0  ;;  %s821_s0 = inlined_call_operand.hbm [shape: f32[16,16,128], index: 0, kind: input, shape index: {}]   ;;  %s822_s1 = inlined_call_operand.hbm [shape: f32[16,128], index: 1, kind: output, shape index: {}]  }
   0x1   :  { %8 = vsyncpa [#allocation3 + $0x1], 0 }
   0x2   :  { %9 = vsyncpa [#allocation4], 0 }
   0x3   :  { %11 = vsyncpa [#allocation4 + $0x1], 0  ;;  %s639_s6 = smov 0   ;;  %s641_s7 = smov 0  }
   0x4   :  { %s643_s8 = smov 0   ;;  %s645_s9 = smov 0  }
   0x5   :  { %s647_s10 = smov 0   ;;  %s649_s11 = smov 0  }
   0x6   :  { %s651_s12 = smov 0   ;;  %s653_s13 = smov 0  }
   0x7   :  { %s655_s14 = smov 0   ;;  %s657_s15 = smov 0  }
   0x8   :  { %s659_s16 = smov 0  }
   0x9 LB: > { %826 = sst [smem:[#allocation8_spill]] %s603_s11  ;;  %s347_s17 = sadd.s32 4294967295, %s623_s16   ;;  %s623_s16 = sphi %s659_s16, %s17_s16   ;;  %s619_s15 = sphi %s657_s15, %s846_s15   ;;  %s615_s14 = sphi %s655_s14, %s845_s14   ;;  %s611_s13 = sphi %s653_s13, %s844_s13   ;;  %s607_s12 = sphi %s651_s12, %s843_s12   ;;  %s603_s11 = sphi %s649_s11, %s835_s11   ;;  %s599_s10 = sphi %s647_s10, %s842_s10   ;;  %s595_s9 = sphi %s645_s9, %s841_s9   ;;  %s591_s8 = sphi %s643_s8, %s840_s8   ;;  %s587_s7 = sphi %s641_s7, %s839_s7   ;;  %s583_s6 = sphi %s639_s6, %s838_s6  }
   0xa   : > { %s348_s18 = sadd.s32 4294967294, %s623_s16   ;;  %s26_s19 = sadd.s32 1, %s615_s14 }
   0xb   : > { %s29_s20 = sadd.s32 1, %s619_s15  ;;  %p27_p0 = scmp.ge.s32.totalorder %s26_s19, 2 }
   0xc   : > { %s38_s21 = sadd.s32 1, %s603_s11  ;;  %p45_p1 = scmp.ne.s32.totalorder %s603_s11, %s599_s10 }
   0xd   : > { %p46_p2 = scmp.eq.s32.totalorder %s623_s16, 0  ;;  %s848_s19 = smov (%p27_p0, %s26_s19), 0 }
   0xe   : > { %827 = sst [smem:[#allocation9_spill]] %s848_s19  ;;  %s850_s20 = smov (!%p27_p0, %s29_s20), %s619_s15 }
   0xf   : > { %s34_s22 = ssub.s32 %s615_s14, %s848_s19  ;;  %p705_p3 = por %p46_p2, %p45_p1 }
  0x10   : > { %p31_p4 = scmp.ge.s32.totalorder %s850_s20, 2  ;;  %p51_p5 = scmp.ne.s32.totalorder %s599_s10, %s595_s9 }
  0x11   : > { %p52_p6 = scmp.eq.s32.totalorder %s347_s17, 0  ;;  %s64_s24 = sadd.s32 1, %s591_s8 }
  0x12   : > { %s852_s20 = smov (%p31_p4, %s850_s20), 0  ;;  %p74_p8 = scmp.ne.s32.totalorder %s591_s8, %s587_s7 }
  0x13   : > { %829 = sst [smem:[#allocation10_spill]] %s852_s20  ;;  %p713_p7 = por %p52_p6, %p51_p5 }
  0x14   : > { %s33_s26 = ssub.s32 %s619_s15, %s852_s20  ;;  %p75_p9 = scmp.eq.s32.totalorder %s347_s17, 3 }
  0x15   : > { %s35_s27 = sor.u32 %s34_s22, %s33_s26  ;;  %p62_p10 = scmp.eq.s32.totalorder %s33_s26, 0 }
  0x16   : > { %p36_p11 = scmp.eq.s32.totalorder %s35_s27, 0  ;;  %p721_p12 = por %p75_p9, %p74_p8 }
  0x17   : > { %s726_s29 = scalar_select %p62_p10, %s591_s8, %s64_s24  }
  0x18   : > { %s729_s30 = scalar_select %p36_p11, %s603_s11, %s38_s21  }
  0x19   : > { %p80_p13 = scmp.ne.s32.totalorder %s587_s7, %s583_s6  ;;  %p81_p0 = scmp.eq.s32.totalorder %s348_s18, 3 }
  0x1a   : > { %832 = sst [smem:[#allocation11_spill]] %s729_s30  ;;  %p377_p1 = scmp.lt.s32.totalorder %s623_s16, 4 }
  0x1b   : > { %p734_p2 = por %p81_p0, %p80_p13  ;;  %s101_s3 = sand.u32 1, %s603_s11  }
  0x1c   : > { %s351_s4 = sshll.u32 %s101_s3, 6  ;;  %s364_s5 = sshll.u32 %s619_s15, 4 }
  0x1d   : > { %s110_s9 = sadd.s32 %s615_s14, %s364_s5  ;;  %s105_s17 = scalar_lea.vmem [#allocation2], %s351_s4 }
  0x1e   : > { %s115_s22 = sshll.u32 %s105_s17, 4  ;;  %s354_s26 = sshll.u32 %s110_s9, 3  ;;  %s116_s22 = int_to_ptr.vmem [resolvable:$true] %s115_s22 }
  0x1f   : > { %s112_s27 = scalar_lea.hbm %s821_s0, %s354_s26  ;;  %p370_p4 = pnand %p377_p1, %p705_p3 }
  0x20   : > { %s113_s18 = sshll.u32 %s112_s27, 4  ;;  %s102_s20 = scalar_lea.sflag [#allocation3], %s101_s3  ;;  %s114_s18 = int_to_ptr.hbm [resolvable:$true] %s113_s18 }
  0x21   : > { %s625_s19 = smov 256   ;;  %s626_s30 = smov 128  }
  0x22   : > { %s627_s11 = smov 8   ;;  %p355_p5 = scmp.ge.s32.totalorder %s623_s16, 1 }
  0x23   : > { %372 = dma.hbm_to_vmem [thread:$0]  (!%p370_p4), %s114_s18, 1024, %s116_s22, %s102_s20, %s625_s19, %s626_s30, %s627_s11  }
  0x24   : > { %p123_p6 = scmp.lt.s32.totalorder %s623_s16, 5 }
  0x26   : > { %p124_p8 = pnand %p355_p5, %p123_p6 }
  0x27   : > { %s129_s4 = sand.u32 (!%p124_p8), 1, %s599_s10  }
  0x28   : > { %127 = sbr.rel (%p124_p8) target bundleno = 103 (0x67), region = 24  ;;  %s356_s5 = sshll.u32 (!%p124_p8), %s129_s4, 6 }
  0x29   : > { %s130_s9 = scalar_lea.sflag (!%p124_p8), [#allocation3], %s129_s4  ;;  %s133_s17 = scalar_lea.vmem (!%p124_p8), [#allocation2], %s356_s5 }
  0x2d   : > { %574 = dma.done.wait (%p713_p7), %s130_s9, 1024  }
  0x2e   : > { %576 = vsyncadd (%p713_p7), %s130_s9, 4294966272  ;;  %s150_s23 = sand.u32 1, %s587_s7   ;;  %p358_p3 = scmp.ne.s32.totalorder %s607_s12, 0 }
  0x2f   : > { %s357_s11 = sshll.u32 %s150_s23, 3 }
  0x30   : > { %s756_s19 = scalar_lea.vmem [#allocation5], %s357_s11  ;;  %157 = sbr.rel (%p358_p3) target bundleno = 55 (0x37), region = 32 }
  0x35   : > { %v628_v0 = vmov 0.0  }
  0x36   : > { %158 = vst [vmem:[%s756_s19] sm:$0xff] %v628_v0 }
  0x37 PF: > { %v159_v1 = vld [vmem:[%s133_s17] sm:$0xff]  ;;  %v160_v2 = vld [vmem:[%s133_s17 + $0x8] sm:$0xff]  ;;  %v161_v3 = vld [vmem:[%s133_s17 + $0x10] sm:$0xff]  ;;  %vm224_vm0 = vcmask 1041409   ;;  %vm226_vm1 = vcmask 1042434   ;;  %vm228_vm2 = vcmask 1043459  }
  0x38   : > { %v162_v4 = vld [vmem:[%s133_s17 + $0x18] sm:$0xff]  ;;  %v163_v5 = vld [vmem:[%s133_s17 + $0x20] sm:$0xff]  ;;  %v164_v6 = vld [vmem:[%s133_s17 + $0x28] sm:$0xff]  ;;  %v168_v7 = vrot.slane %v159_v1, 4  ;;  %v174_v8 = vrot.slane %v160_v2, 4  ;;  %v180_v9 = vrot.slane %v161_v3, 4 }
  0x39   : > { %v165_v10 = vld [vmem:[%s133_s17 + $0x30] sm:$0xff]  ;;  %v166_v11 = vld [vmem:[%s133_s17 + $0x38] sm:$0xff]  ;;  %v186_v12 = vrot.slane %v162_v4, 4  ;;  %v192_v13 = vrot.slane %v163_v5, 4  ;;  %v198_v14 = vrot.slane %v164_v6, 4  ;;  %vm230_vm3 = vcmask 1044484  }
  0x3a   : > { %v169_v15 = vadd.f32 %v168_v7, %v159_v1  ;;  %v175_v16 = vadd.f32 %v174_v8, %v160_v2  ;;  %v181_v17 = vadd.f32 %v180_v9, %v161_v3  ;;  %v204_v18 = vrot.slane %v165_v10, 4  ;;  %p359_p7 = scmp.ne.s32.totalorder %s607_s12, 1 }
  0x3b   : > { %v187_v19 = vadd.f32 %v186_v12, %v162_v4  ;;  %v193_v20 = vadd.f32 %v192_v13, %v163_v5  ;;  %v199_v21 = vadd.f32 %v198_v14, %v164_v6  ;;  %v210_v22 = vrot.slane %v166_v11, 4 }
  0x3c   : > { %v170_v23 = vrot.slane %v169_v15, 2  ;;  %v176_v24 = vrot.slane %v175_v16, 2  ;;  %v182_v25 = vrot.slane %v181_v17, 2  ;;  %v205_v26 = vadd.f32 %v204_v18, %v165_v10 }
  0x3d   : > { %v188_v27 = vrot.slane %v187_v19, 2  ;;  %v194_v28 = vrot.slane %v193_v20, 2  ;;  %v200_v29 = vrot.slane %v199_v21, 2  ;;  %v211_v30 = vadd.f32 %v210_v22, %v166_v11  ;;  %v167_v61 = vld [vmem:[%s756_s19] sm:$0xff] }
  0x3e   : > { %v171_v31 = vadd.f32 %v170_v23, %v169_v15  ;;  %v177_v32 = vadd.f32 %v176_v24, %v175_v16  ;;  %v183_v33 = vadd.f32 %v182_v25, %v181_v17  ;;  %v206_v34 = vrot.slane %v205_v26, 2 }
  0x3f   : > { %v189_v35 = vadd.f32 %v188_v27, %v187_v19  ;;  %v195_v36 = vadd.f32 %v194_v28, %v193_v20  ;;  %v201_v37 = vadd.f32 %v200_v29, %v199_v21  ;;  %v212_v38 = vrot.slane %v211_v30, 2 }
  0x40   : > { %v172_v39 = vrot.slane %v171_v31, 1  ;;  %v178_v40 = vrot.slane %v177_v32, 1  ;;  %v184_v41 = vrot.slane %v183_v33, 1  ;;  %v207_v42 = vadd.f32 %v206_v34, %v205_v26 }
  0x41   : > { %v190_v43 = vrot.slane %v189_v35, 1  ;;  %v196_v44 = vrot.slane %v195_v36, 1  ;;  %v202_v45 = vrot.slane %v201_v37, 1  ;;  %v213_v46 = vadd.f32 %v212_v38, %v211_v30 }
  0x42   : > { %v173_v47 = vadd.f32 %v172_v39, %v171_v31  ;;  %v179_v48 = vadd.f32 %v178_v40, %v177_v32  ;;  %v185_v49 = vadd.f32 %v184_v41, %v183_v33  ;;  %v208_v50 = vrot.slane %v207_v42, 1 }
  0x43   : > { %v191_v51 = vadd.f32 %v190_v43, %v189_v35  ;;  %v197_v52 = vadd.f32 %v196_v44, %v195_v36  ;;  %v214_v53 = vrot.slane %v213_v46, 1  ;;  %v203_v54 = vadd.f32 %v202_v45, %v201_v37 }
  0x44   : > { %v225_v55 = vsel %vm224_vm0, %v179_v48, %v173_v47  ;;  %v209_v56 = vadd.f32 %v208_v50, %v207_v42  ;;  %vm232_vm4 = vcmask 1045509   ;;  %vm234_vm5 = vcmask 1046534  }
  0x45   : > { %v227_v57 = vsel %vm226_vm1, %v185_v49, %v225_v55  ;;  %v215_v58 = vadd.f32 %v214_v53, %v213_v46  ;;  %vm236_vm6 = vcmask 1047559  }
  0x46   : > { %v229_v59 = vsel %vm228_vm2, %v191_v51, %v227_v57 }
  0x47   : > { %v231_v60 = vsel %vm230_vm3, %v197_v52, %v229_v59 }
  0x48   : > { %v233_v62 = vsel %vm232_vm4, %v203_v54, %v231_v60 }
  0x49   : > { %v235_v63 = vsel %vm234_vm5, %v209_v56, %v233_v62  ;;  %244 = sbr.rel (%p359_p7) target bundleno = 88 (0x58), region = 36 }
  0x4a   : > { %v237_v0 = vsel %vm236_vm6, %v215_v58, %v235_v63 }
  0x4b   : > { %v239_v1 = vadd.f32 %v237_v0, %v167_v61 }
  0x4d   : > { %240 = vst [vmem:[%s756_s19] sm:$0xff] %v239_v1 }
  0x54   : > { %v245_v2 = vld [vmem:[%s756_s19] sm:$0xff] }
  0x55   : > { %v246_v3 = vmul.f32 0.015625, %v245_v2 }
  0x57   : > { %247 = vst [vmem:[%s756_s19] sm:$0xff] %v246_v3 }
  0x58 PF: > { %s361_s20 = sshll.u32 %s611_s13, 3  ;;  %s261_s22 = sshll.u32 %s756_s19, 4  ;;  %s262_s22 = int_to_ptr.vmem [resolvable:$true] %s261_s22 }
  0x59   : > { %s259_s3 = scalar_lea.hbm %s822_s1, %s361_s20  ;;  %s249_s12 = scalar_lea.sflag [#allocation4], %s150_s23 }
  0x5a   : > { %s263_s26 = sshll.u32 %s259_s3, 4  ;;  %s521_s13 = scalar_lea.hbm %s822_s1, 16  ;;  %s264_s26 = int_to_ptr.hbm [resolvable:$true] %s263_s26 }
  0x5b   : > { %s515_s24 = sshra.s32 %s264_s26, 4  ;;  %s516_s24 = int_to_ptr.hbm [resolvable:$true] %s515_s24 }
  0x5c   : > { %s517_s21 = scalar_lea.hbm %s516_s24, 8  ;;  %p522_p13 = scmp.lt.s32.totalorder %s516_s24, %s822_s1 }
  0x5d   : > { %p518_p9 = scmp.ne.s32.totalorder %s516_s24, %s517_s21  ;;  %p523_p0 = scmp.lt.s32.totalorder %s521_s13, %s517_s21 }
  0x5f   : > { %p519_p10 = pnand %p518_p9, %p721_p12  ;;  %p524_p1 = por %p523_p0, %p522_p13 }
  0x61   : > { %p520_p11 = pneg %p519_p10 }
  0x63   : > { %p525_p4 = pnand %p524_p1, %p520_p11 }
  0x65   : > { %528 = shalt.err (!%p525_p4)
}
  0x66   : > { %367 = dma.vmem_to_hbm [thread:$0]  (%p721_p12), %s262_s22, 128, %s264_s26, %s249_s12  }
  0x67 PF: > { %p378_p5 = scmp.ge.s32.totalorder %s623_s16, 2  ;;  %s275_s9 = sand.u32 1, %s583_s6  }
  0x68   : > { %s276_s17 = scalar_lea.sflag [#allocation4], %s275_s9 }
  0x69   : > { %p374_p6 = pnand %p378_p5, %p734_p2 }
  0x6b   : > { %p375_p8 = pneg %p374_p6 }
  0x6d   : > { %578 = dma.done.wait (%p375_p8), %s276_s17, 128  }
  0x6e   : > { %580 = vsyncadd (%p375_p8), %s276_s17, 4294967168  ;;  %s17_s16 = sadd.s32 1, %s623_s16   ;;  %s834_s28 = sld [smem:[#allocation8_spill]] }
  0x6f   : > { %p14_p3 = scmp.ge.s32.totalorder %s17_s16, 6   ;;  %s835_s11 = sld [smem:[#allocation11_spill]] }
  0x70   : > { %s836_s23 = sld [smem:[#allocation9_spill]]  ;;  %s838_s6 = smov %s587_s7 }
  0x71   : > { %s837_s19 = sld [smem:[#allocation10_spill]]  ;;  %s839_s7 = smov %s591_s8 }
  0x72   : > { %s840_s8 = smov %s726_s29  ;;  %s841_s9 = smov %s599_s10 }
  0x73   : > { %s843_s12 = smov %s615_s14  ;;  %s844_s13 = smov %s619_s15 }
  0x74   : > { %s842_s10 = smov %s834_s28  ;;  %16 = sbr.rel (!%p14_p3) target bundleno = 9 (0x9), region = 77 }
  0x76   : > { %s845_s14 = smov %s836_s23 }
  0x77   : > { %s846_s15 = smov %s837_s19 }
  0x79   :  { %282 = vsyncpa [#allocation3], 1 }
  0x7a   :  { %284 = vsyncpa [#allocation3 + $0x1], 1 }
  0x7b   :  { %285 = vsyncpa [#allocation4], 1 }
  0x7c   :  { %287 = vsyncpa [#allocation4 + $0x1], 1 }

</bundles_post_ra>
